<compile_context>
chip_gen: v5e
topology: v5e:2x2
jax: 0.10.0
libtpu: 0.0.40
codegen_flags: <defaults>
</compile_context>

<pallas_src>
import functools

import jax
import jax.numpy as jnp
import numpy as np
from jax.experimental import pallas as pl
from jax.experimental.pallas import tpu as pltpu


# ---------------------------------------------------------------------------
# Small helpers
# ---------------------------------------------------------------------------
def _sigmoid_exact(x):
    # Exact sigmoid for the tiny (1, TN) / (C, 1) activations.
    return 1.0 / (1.0 + jnp.exp(-x))


def _sigmoid_eup(x):
    # tanh-form sigmoid: rides the EUP slot instead of the exact f32 divide.
    return 0.5 * (jnp.tanh(0.5 * x) + 1.0)


def _round_up(x, m):
    return ((x + m - 1) // m) * m


def _vmem_limits():
    """Chip-aware scoped-VMEM limit and tile byte budget."""
    try:
        cap = int(pltpu.get_tpu_info().vmem_capacity_bytes)
    except Exception:
        cap = 128 << 20
    if cap <= (64 << 20):          # v7x-class: 64 MiB physical per TensorCore
        limit = 44 << 20
    else:                          # v5e / v6e: 128 MiB physical
        limit = 64 << 20
    budget = int(limit * 0.55)     # blocks (double-buffered) + f32 temporaries
    return limit, budget


def _per_lane_bytes(c, d, in_itemsize):
    # x1, x2, out blocks double-buffered + f32 temporaries (u, s, attention).
    return 3 * 2 * c * in_itemsize + (2 * c + d) * 4


def _pad_lanes(x, npad):
    n = x.shape[-1]
    if npad == n:
        return x
    return jnp.pad(x, ((0, 0), (0, 0), (0, npad - n)))


# ---------------------------------------------------------------------------
# Kernels
# ---------------------------------------------------------------------------
def _fused_kernel(x1_ref, x2_ref, w1_ref, b1_ref, w2d_ref, b2d_ref,
                  w5_ref, b5_ref, w4d_ref, b4d_ref, o_ref, *, inv_n):
    """Single-pass per-batch kernel: mean + channel MLP + spatial att + blend.

    x1_ref/x2_ref/o_ref : (1, C, Npad)   (padded lanes are zero)
    w1 (d, C), b1 (d, 1), w2d (C, d), b2d (C, 1)
    w5 (d, C), b5 (d, 1), w4d (d, 1), b4d (1,) in SMEM
    """
    x1 = x1_ref[0].astype(jnp.float32)                  # (C, Npad)
    x2 = x2_ref[0].astype(jnp.float32)
    u = x1 + x2                                         # fea_u

    # ---- channel attention (tiny, once per batch) ----
    c = jnp.sum(u, axis=1, keepdims=True) * inv_n       # (C, 1); pads are 0
    z = jnp.maximum(
        jnp.dot(w1_ref[...], c, preferred_element_type=jnp.float32)
        + b1_ref[...], 0.0)                              # (d, 1)
    ac0 = _sigmoid_exact(
        jnp.dot(w2d_ref[...], z, preferred_element_type=jnp.float32)
        + b2d_ref[...])                                  # (C, 1)
    acm1 = ac0 - 1.0

    # ---- spatial attention ----
    s = jnp.maximum(
        jnp.dot(w5_ref[...], u, preferred_element_type=jnp.float32)
        + b5_ref[...], 0.0)                              # (d, Npad)
    lsd = jnp.sum(w4d_ref[...] * s, axis=0, keepdims=True) + b4d_ref[0]
    as0 = _sigmoid_exact(lsd)                            # (1, Npad)

    # softmax over the 2 branches of (ac * as) == sigmoid(ac0 + as0 - 1)
    att0 = _sigmoid_eup(acm1 + as0)                      # (C, Npad)
    o_ref[0] = (x2 + (x1 - x2) * att0).astype(o_ref.dtype)


def _blend_kernel(acm1_ref, x1_ref, x2_ref, w5_ref, b5_ref, w4d_ref,
                  b4d_ref, o_ref):
    """Streaming tile kernel; channel attention (acm1 = ac0 - 1) precomputed.

    acm1_ref : (1, C, 1), x1/x2/o : (1, C, TN)
    w5 (d, C), b5 (d, 1), w4d (d, 1), b4d (1,) in SMEM
    """
    x1 = x1_ref[0].astype(jnp.float32)
    x2 = x2_ref[0].astype(jnp.float32)
    u = x1 + x2

    s = jnp.maximum(
        jnp.dot(w5_ref[...], u, preferred_element_type=jnp.float32)
        + b5_ref[...], 0.0)                              # (d, TN)
    # Spatial-logit difference via sublane reduce (keeps the M=1 row off MXU).
    lsd = jnp.sum(w4d_ref[...] * s, axis=0, keepdims=True) + b4d_ref[0]
    as0 = _sigmoid_exact(lsd)                            # (1, TN)

    att0 = _sigmoid_eup(acm1_ref[0] + as0)               # (C, TN)
    o_ref[0] = (x2 + (x1 - x2) * att0).astype(o_ref.dtype)


# ---------------------------------------------------------------------------
# Wrapper
# ---------------------------------------------------------------------------
@functools.partial(jax.jit, static_argnames=("tile_lanes",))
def attention_fusion_pallas(x1, x2, params, *, tile_lanes=None):
    """x1, x2: (B, C, D, H, W). Returns fused features, same shape/dtype."""
    B, C, D, H, W = x1.shape
    N = D * H * W
    d = params["w1"].shape[0]
    out_dtype = x1.dtype
    in_itemsize = np.dtype(x1.dtype).itemsize

    # Native dtype straight through the DMA boundary (no f32 upcast pass).
    x1f = x1.reshape(B, C, N)
    x2f = x2.reshape(B, C, N)

    # Pre-folded f32 parameters (tiny).
    w1 = params["w1"].astype(jnp.float32)                            # (d, C)
    b1 = params["b1"].astype(jnp.float32)                            # (d, 1)
    w2d = (params["w2_0"] - params["w2_1"]).astype(jnp.float32)      # (C, d)
    b2d = (params["b2_0"] - params["b2_1"]).astype(jnp.float32)      # (C, 1)
    w5 = params["w5"].astype(jnp.float32)                            # (d, C)
    b5 = params["b5"].astype(jnp.float32)                            # (d, 1)
    w4d = (params["w4_0"] - params["w4_1"]).reshape(d, 1).astype(jnp.float32)
    b4d = (params["b4_0"] - params["b4_1"]).reshape(1).astype(jnp.float32)

    limit, budget = _vmem_limits()
    per_lane = _per_lane_bytes(C, d, in_itemsize)
    n128 = _round_up(N, 128)

    use_fused = (tile_lanes is None) and (per_lane * n128 <= budget)

    if use_fused:
        # ---- single-pass path: everything in one kernel, grid=(B,) ----
        npad = n128
        x1p = _pad_lanes(x1f, npad)
        x2p = _pad_lanes(x2f, npad)
        kern = functools.partial(_fused_kernel, inv_n=1.0 / float(N))
        grid_spec = pltpu.PrefetchScalarGridSpec(
            num_scalar_prefetch=0,
            grid=(B,),
            in_specs=[
                pl.BlockSpec((1, C, npad), lambda b: (b, 0, 0)),     # x1
                pl.BlockSpec((1, C, npad), lambda b: (b, 0, 0)),     # x2
                pl.BlockSpec((d, C), lambda b: (0, 0)),              # w1
                pl.BlockSpec((d, 1), lambda b: (0, 0)),              # b1
                pl.BlockSpec((C, d), lambda b: (0, 0)),              # w2d
                pl.BlockSpec((C, 1), lambda b: (0, 0)),              # b2d
                pl.BlockSpec((d, C), lambda b: (0, 0)),              # w5
                pl.BlockSpec((d, 1), lambda b: (0, 0)),              # b5
                pl.BlockSpec((d, 1), lambda b: (0, 0)),              # w4d
                pl.BlockSpec(memory_space=pltpu.MemorySpace.SMEM),   # b4d
            ],
            out_specs=pl.BlockSpec((1, C, npad), lambda b: (b, 0, 0)),
        )
        out = pl.pallas_call(
            kern,
            out_shape=jax.ShapeDtypeStruct((B, C, npad), out_dtype),
            grid_spec=grid_spec,
            compiler_params=pltpu.CompilerParams(
                dimension_semantics=("parallel",),
                vmem_limit_bytes=limit),
        )(x1p, x2p, w1, b1, w2d, b2d, w5, b5, w4d, b4d)
    else:
        # ---- tiled streaming path ----
        # Channel attention ((B, C)-sized) as a fused XLA add+reduce pre-pass;
        # the (B, C, N) sum is never materialized in HBM.
        cmean = jnp.mean(x1f.astype(jnp.float32) + x2f.astype(jnp.float32),
                         axis=2)                                     # (B, C)
        z = jax.nn.relu(cmean @ w1.T + b1[:, 0])                     # (B, d)
        ac0 = jax.nn.sigmoid(z @ w2d.T + b2d[:, 0])                  # (B, C)
        acm1 = (ac0 - 1.0).reshape(B, C, 1).astype(jnp.float32)

        # C-aware, budget-derived lane tile (multiple of 128).
        if tile_lanes is not None:
            tn = max(128, _round_up(int(tile_lanes), 128))
        else:
            tn = max(128, (budget // per_lane) // 128 * 128)
        tn = min(tn, n128)
        n_tiles = pl.cdiv(n128, tn)
        tn = _round_up(pl.cdiv(n128, n_tiles), 128)   # even, lane-dense tiles
        npad = tn * n_tiles
        x1p = _pad_lanes(x1f, npad)
        x2p = _pad_lanes(x2f, npad)

        nt = n_tiles  # captured by the index maps
        grid_spec = pltpu.PrefetchScalarGridSpec(
            num_scalar_prefetch=0,
            grid=(B * nt,),   # single flat parallel axis (megacore-friendly)
            in_specs=[
                pl.BlockSpec((1, C, 1), lambda i: (i // nt, 0, 0)),        # acm1
                pl.BlockSpec((1, C, tn), lambda i: (i // nt, 0, i % nt)),  # x1
                pl.BlockSpec((1, C, tn), lambda i: (i // nt, 0, i % nt)),  # x2
                pl.BlockSpec((d, C), lambda i: (0, 0)),                    # w5
                pl.BlockSpec((d, 1), lambda i: (0, 0)),                    # b5
                pl.BlockSpec((d, 1), lambda i: (0, 0)),                    # w4d
                pl.BlockSpec(memory_space=pltpu.MemorySpace.SMEM),         # b4d
            ],
            out_specs=pl.BlockSpec((1, C, tn), lambda i: (i // nt, 0, i % nt)),
        )
        out = pl.pallas_call(
            _blend_kernel,
            out_shape=jax.ShapeDtypeStruct((B, C, npad), out_dtype),
            grid_spec=grid_spec,
            compiler_params=pltpu.CompilerParams(
                dimension_semantics=("parallel",),
                vmem_limit_bytes=limit),
        )(acm1, x1p, x2p, w5, b5, w4d, b4d)

    if npad != N:
        out = out[:, :, :N]
    return out.reshape(B, C, D, H, W)


# ---------------------------------------------------------------------------
# Pure-JAX reference (mirrors the PyTorch forward exactly)
# ---------------------------------------------------------------------------
def attention_fusion_ref(x1, x2, p):
    u = x1 + x2                                            # (B,C,D,H,W)
    c = u.mean(axis=(2, 3, 4))                             # (B,C)
    z = jax.nn.relu(c @ p["w1"].T + p["b1"][:, 0])         # (B,d)
    lc = jnp.stack([z @ p["w2_0"].T + p["b2_0"][:, 0],
                    z @ p["w2_1"].T + p["b2_1"][:, 0]], axis=1)      # (B,2,C)
    ac = jax.nn.softmax(lc, axis=1)
    s = jax.nn.relu(jnp.einsum("dc,bcxyz->bdxyz", p["w5"], u)
                    + p["b5"][:, 0][None, :, None, None, None])      # (B,d,...)
    ls = jnp.stack(
        [jnp.einsum("od,bdxyz->bxyz", p["w4_0"], s) + p["b4_0"][0, 0],
         jnp.einsum("od,bdxyz->bxyz", p["w4_1"], s) + p["b4_1"][0, 0]],
        axis=1)                                            # (B,2,D,H,W)
    asp = jax.nn.softmax(ls, axis=1)
    att = ac[:, :, :, None, None, None] * asp[:, :, None, :, :, :]
    att = jax.nn.softmax(att, axis=1)
    feas = jnp.stack([x1, x2], axis=1)
    return (feas * att).sum(axis=1)


def make_params(key, features, r):
    d = features // r
    ks = jax.random.split(key, 12)
    scale = 0.5

    def w(k, shape):
        return scale * jax.random.normal(k, shape, dtype=jnp.float32)

    return {
        "w1":   w(ks[0], (d, features)),   "b1":   w(ks[1], (d, 1)),
        "w2_0": w(ks[2], (features, d)),   "b2_0": w(ks[3], (features, 1)),
        "w2_1": w(ks[4], (features, d)),   "b2_1": w(ks[5], (features, 1)),
        "w5":   w(ks[6], (d, features)),   "b5":   w(ks[7], (d, 1)),
        "w4_0": w(ks[8], (1, d)),          "b4_0": w(ks[9], (1, 1)),
        "w4_1": w(ks[10], (1, d)),         "b4_1": w(ks[11], (1, 1)),
    }


if __name__ == "__main__":
    B, features, r = 2, 8, 2
    D = H = W = 8

    key = jax.random.PRNGKey(0)
    k1, k2, kp = jax.random.split(key, 3)
    x1 = jax.random.normal(k1, (B, features, D, H, W), dtype=jnp.float32)
    x2 = jax.random.normal(k2, (B, features, D, H, W), dtype=jnp.float32)
    params = make_params(kp, features, r)

    ref = attention_fusion_ref(x1, x2, params)

    # Fused single-pass path (per-batch slab fits the VMEM budget).
    out_fused = jax.block_until_ready(attention_fusion_pallas(x1, x2, params))
    np.testing.assert_allclose(np.asarray(out_fused), np.asarray(ref),
                               rtol=1e-5, atol=1e-5)

    # Tiled streaming path (forced small tile exercises the large-shape path).
    out_tiled = jax.block_until_ready(
        attention_fusion_pallas(x1, x2, params, tile_lanes=128))
    np.testing.assert_allclose(np.asarray(out_tiled), np.asarray(ref),
                               rtol=1e-5, atol=1e-5)

    print("KERNEL_OK")
</pallas_src>

<mosaic_0001>
module attributes {stable_mosaic.version = 11 : i64} {
  func.func @_fused_kernel(%arg0: i32, %arg1: memref<1x8x512xf32, #tpu.memory_space<vmem>>, %arg2: memref<1x8x512xf32, #tpu.memory_space<vmem>>, %arg3: memref<4x8xf32, #tpu.memory_space<vmem>>, %arg4: memref<4x1xf32, #tpu.memory_space<vmem>>, %arg5: memref<8x4xf32, #tpu.memory_space<vmem>>, %arg6: memref<8x1xf32, #tpu.memory_space<vmem>>, %arg7: memref<4x8xf32, #tpu.memory_space<vmem>>, %arg8: memref<4x1xf32, #tpu.memory_space<vmem>>, %arg9: memref<4x1xf32, #tpu.memory_space<vmem>>, %arg10: memref<1xf32, #tpu.memory_space<smem>>, %arg11: memref<1x8x512xf32, #tpu.memory_space<vmem>>) attributes {dimension_semantics = [#tpu.dimension_semantics<parallel>], iteration_bounds = array<i64: 2>, scalar_prefetch = 0 : i64, scratch_operands = 0 : i64, tpu.core_type = #tpu.core_type<tc>, window_params = [{transform_indices = @transform_0, window_bounds = array<i64: 1, 8, 512>}, {transform_indices = @transform_1, window_bounds = array<i64: 1, 8, 512>}, {pipeline_mode = #tpu.pipeline_mode<synchronous>, transform_indices = @transform_2, window_bounds = array<i64: 4, 8>}, {pipeline_mode = #tpu.pipeline_mode<synchronous>, transform_indices = @transform_3, window_bounds = array<i64: 4, 1>}, {pipeline_mode = #tpu.pipeline_mode<synchronous>, transform_indices = @transform_4, window_bounds = array<i64: 8, 4>}, {pipeline_mode = #tpu.pipeline_mode<synchronous>, transform_indices = @transform_5, window_bounds = array<i64: 8, 1>}, {pipeline_mode = #tpu.pipeline_mode<synchronous>, transform_indices = @transform_6, window_bounds = array<i64: 4, 8>}, {pipeline_mode = #tpu.pipeline_mode<synchronous>, transform_indices = @transform_7, window_bounds = array<i64: 4, 1>}, {pipeline_mode = #tpu.pipeline_mode<synchronous>, transform_indices = @transform_8, window_bounds = array<i64: 4, 1>}, {transform_indices = @transform_9, window_bounds = array<i64: 1>}, {transform_indices = @transform_10, window_bounds = array<i64: 1, 8, 512>}]} {
    %c0 = arith.constant 0 : index
    %c0_0 = arith.constant 0 : index
    %c0_1 = arith.constant 0 : index
    %0 = vector.load %arg1[%c0, %c0_0, %c0_1] : memref<1x8x512xf32, #tpu.memory_space<vmem>>, vector<1x8x512xf32>
    %1 = vector.shape_cast %0 : vector<1x8x512xf32> to vector<8x512xf32>
    %c0_2 = arith.constant 0 : index
    %c0_3 = arith.constant 0 : index
    %c0_4 = arith.constant 0 : index
    %2 = vector.load %arg2[%c0_2, %c0_3, %c0_4] : memref<1x8x512xf32, #tpu.memory_space<vmem>>, vector<1x8x512xf32>
    %3 = vector.shape_cast %2 : vector<1x8x512xf32> to vector<8x512xf32>
    %4 = arith.addf %1, %3 : vector<8x512xf32>
    %cst = arith.constant dense<0.000000e+00> : vector<8xf32>
    %5 = vector.multi_reduction <add>, %4, %cst [1] : vector<8x512xf32> to vector<8xf32>
    %6 = vector.shape_cast %5 : vector<8xf32> to vector<8x1xf32>
    %cst_5 = arith.constant 0.001953125 : f32
    %7 = vector.broadcast %cst_5 : f32 to vector<8x1xf32>
    %8 = arith.mulf %6, %7 : vector<8x1xf32>
    %c0_6 = arith.constant 0 : index
    %c0_7 = arith.constant 0 : index
    %9 = vector.load %arg3[%c0_6, %c0_7] : memref<4x8xf32, #tpu.memory_space<vmem>>, vector<4x8xf32>
    %cst_8 = arith.constant dense<0.000000e+00> : vector<4x1xf32>
    %10 = tpu.matmul %9, %8, %cst_8 {dimension_numbers = #tpu.dot_dimension_numbers<[1], [0], [0], [1], [0, 0, 1, 1], [], []>} : vector<4x8xf32>, vector<8x1xf32>, vector<4x1xf32> -> vector<4x1xf32>
    %c0_9 = arith.constant 0 : index
    %c0_10 = arith.constant 0 : index
    %11 = vector.load %arg4[%c0_9, %c0_10] : memref<4x1xf32, #tpu.memory_space<vmem>>, vector<4x1xf32>
    %12 = arith.addf %10, %11 : vector<4x1xf32>
    %cst_11 = arith.constant 0.000000e+00 : f32
    %13 = vector.broadcast %cst_11 : f32 to vector<4x1xf32>
    %14 = arith.maximumf %12, %13 : vector<4x1xf32>
    %c0_12 = arith.constant 0 : index
    %c0_13 = arith.constant 0 : index
    %15 = vector.load %arg5[%c0_12, %c0_13] : memref<8x4xf32, #tpu.memory_space<vmem>>, vector<8x4xf32>
    %cst_14 = arith.constant dense<0.000000e+00> : vector<8x1xf32>
    %16 = tpu.matmul %15, %14, %cst_14 {dimension_numbers = #tpu.dot_dimension_numbers<[1], [0], [0], [1], [0, 0, 1, 1], [], []>} : vector<8x4xf32>, vector<4x1xf32>, vector<8x1xf32> -> vector<8x1xf32>
    %c0_15 = arith.constant 0 : index
    %c0_16 = arith.constant 0 : index
    %17 = vector.load %arg6[%c0_15, %c0_16] : memref<8x1xf32, #tpu.memory_space<vmem>>, vector<8x1xf32>
    %18 = arith.addf %16, %17 : vector<8x1xf32>
    %cst_17 = arith.constant 0.000000e+00 : f32
    %19 = vector.broadcast %cst_17 : f32 to vector<8x1xf32>
    %20 = arith.subf %19, %18 : vector<8x1xf32>
    %21 = math.exp %20 : vector<8x1xf32>
    %cst_18 = arith.constant 1.000000e+00 : f32
    %22 = vector.broadcast %cst_18 : f32 to vector<8x1xf32>
    %23 = arith.addf %22, %21 : vector<8x1xf32>
    %cst_19 = arith.constant 1.000000e+00 : f32
    %24 = vector.broadcast %cst_19 : f32 to vector<8x1xf32>
    %25 = arith.divf %24, %23 : vector<8x1xf32>
    %cst_20 = arith.constant 1.000000e+00 : f32
    %26 = vector.broadcast %cst_20 : f32 to vector<8x1xf32>
    %27 = arith.subf %25, %26 : vector<8x1xf32>
    %c0_21 = arith.constant 0 : index
    %c0_22 = arith.constant 0 : index
    %28 = vector.load %arg7[%c0_21, %c0_22] : memref<4x8xf32, #tpu.memory_space<vmem>>, vector<4x8xf32>
    %cst_23 = arith.constant dense<0.000000e+00> : vector<4x512xf32>
    %29 = tpu.matmul %28, %4, %cst_23 {dimension_numbers = #tpu.dot_dimension_numbers<[1], [0], [0], [1], [0, 0, 1, 1], [], []>} : vector<4x8xf32>, vector<8x512xf32>, vector<4x512xf32> -> vector<4x512xf32>
    %c0_24 = arith.constant 0 : index
    %c0_25 = arith.constant 0 : index
    %30 = vector.load %arg8[%c0_24, %c0_25] : memref<4x1xf32, #tpu.memory_space<vmem>>, vector<4x1xf32>
    %31 = vector.broadcast %30 : vector<4x1xf32> to vector<4x512xf32>
    %32 = arith.addf %29, %31 : vector<4x512xf32>
    %cst_26 = arith.constant 0.000000e+00 : f32
    %33 = vector.broadcast %cst_26 : f32 to vector<4x512xf32>
    %34 = arith.maximumf %32, %33 : vector<4x512xf32>
    %c0_27 = arith.constant 0 : index
    %c0_28 = arith.constant 0 : index
    %35 = vector.load %arg9[%c0_27, %c0_28] : memref<4x1xf32, #tpu.memory_space<vmem>>, vector<4x1xf32>
    %36 = vector.broadcast %35 : vector<4x1xf32> to vector<4x512xf32>
    %37 = arith.mulf %36, %34 : vector<4x512xf32>
    %cst_29 = arith.constant dense<0.000000e+00> : vector<512xf32>
    %38 = vector.multi_reduction <add>, %37, %cst_29 [0] : vector<4x512xf32> to vector<512xf32>
    %39 = vector.shape_cast %38 : vector<512xf32> to vector<1x512xf32>
    %c0_30 = arith.constant 0 : index
    %40 = memref.load %arg10[%c0_30] : memref<1xf32, #tpu.memory_space<smem>>
    %41 = vector.broadcast %40 : f32 to vector<1x512xf32>
    %42 = arith.addf %39, %41 : vector<1x512xf32>
    %cst_31 = arith.constant 0.000000e+00 : f32
    %43 = vector.broadcast %cst_31 : f32 to vector<1x512xf32>
    %44 = arith.subf %43, %42 : vector<1x512xf32>
    %45 = math.exp %44 : vector<1x512xf32>
    %cst_32 = arith.constant 1.000000e+00 : f32
    %46 = vector.broadcast %cst_32 : f32 to vector<1x512xf32>
    %47 = arith.addf %46, %45 : vector<1x512xf32>
    %cst_33 = arith.constant 1.000000e+00 : f32
    %48 = vector.broadcast %cst_33 : f32 to vector<1x512xf32>
    %49 = arith.divf %48, %47 : vector<1x512xf32>
    %50 = vector.broadcast %27 : vector<8x1xf32> to vector<8x512xf32>
    %51 = vector.broadcast %49 : vector<1x512xf32> to vector<8x512xf32>
    %52 = arith.addf %50, %51 : vector<8x512xf32>
    %cst_34 = arith.constant 5.000000e-01 : f32
    %53 = vector.broadcast %cst_34 : f32 to vector<8x512xf32>
    %54 = arith.mulf %53, %52 : vector<8x512xf32>
    %55 = math.tanh %54 : vector<8x512xf32>
    %cst_35 = arith.constant 1.000000e+00 : f32
    %56 = vector.broadcast %cst_35 : f32 to vector<8x512xf32>
    %57 = arith.addf %55, %56 : vector<8x512xf32>
    %cst_36 = arith.constant 5.000000e-01 : f32
    %58 = vector.broadcast %cst_36 : f32 to vector<8x512xf32>
    %59 = arith.mulf %58, %57 : vector<8x512xf32>
    %60 = arith.subf %1, %3 : vector<8x512xf32>
    %61 = arith.mulf %60, %59 : vector<8x512xf32>
    %62 = arith.addf %3, %61 : vector<8x512xf32>
    %c0_37 = arith.constant 0 : index
    %c0_38 = arith.constant 0 : index
    %c0_39 = arith.constant 0 : index
    %63 = vector.load %arg11[%c0_37, %c0_38, %c0_39] : memref<1x8x512xf32, #tpu.memory_space<vmem>>, vector<1x8x512xf32>
    %64 = vector.shape_cast %63 : vector<1x8x512xf32> to vector<8x512xf32>
    %65 = vector.shape_cast %62 : vector<8x512xf32> to vector<1x8x512xf32>
    tpu.vector_store %arg11[%c0_37, %c0_38, %c0_39], %65 {strides = array<i32>} : memref<1x8x512xf32, #tpu.memory_space<vmem>>, vector<1x8x512xf32>,
    return
  }
  func.func @transform_0(%arg0: i32) -> (i32, i32, i32) {
    %c0_i32 = arith.constant 0 : i32
    %c0_i32_0 = arith.constant 0 : i32
    %c0_i32_1 = arith.constant 0 : i32
    return %arg0, %c0_i32, %c0_i32_0 : i32, i32, i32
  }
  func.func @transform_1(%arg0: i32) -> (i32, i32, i32) {
    %c0_i32 = arith.constant 0 : i32
    %c0_i32_0 = arith.constant 0 : i32
    %c0_i32_1 = arith.constant 0 : i32
    return %arg0, %c0_i32, %c0_i32_0 : i32, i32, i32
  }
  func.func @transform_2(%arg0: i32) -> (i32, i32) {
    %c0_i32 = arith.constant 0 : i32
    %c0_i32_0 = arith.constant 0 : i32
    %c0_i32_1 = arith.constant 0 : i32
    return %c0_i32, %c0_i32_0 : i32, i32
  }
  func.func @transform_3(%arg0: i32) -> (i32, i32) {
    %c0_i32 = arith.constant 0 : i32
    %c0_i32_0 = arith.constant 0 : i32
    %c0_i32_1 = arith.constant 0 : i32
    return %c0_i32, %c0_i32_0 : i32, i32
  }
  func.func @transform_4(%arg0: i32) -> (i32, i32) {
    %c0_i32 = arith.constant 0 : i32
    %c0_i32_0 = arith.constant 0 : i32
    %c0_i32_1 = arith.constant 0 : i32
    return %c0_i32, %c0_i32_0 : i32, i32
  }
  func.func @transform_5(%arg0: i32) -> (i32, i32) {
    %c0_i32 = arith.constant 0 : i32
    %c0_i32_0 = arith.constant 0 : i32
    %c0_i32_1 = arith.constant 0 : i32
    return %c0_i32, %c0_i32_0 : i32, i32
  }
  func.func @transform_6(%arg0: i32) -> (i32, i32) {
    %c0_i32 = arith.constant 0 : i32
    %c0_i32_0 = arith.constant 0 : i32
    %c0_i32_1 = arith.constant 0 : i32
    return %c0_i32, %c0_i32_0 : i32, i32
  }
  func.func @transform_7(%arg0: i32) -> (i32, i32) {
    %c0_i32 = arith.constant 0 : i32
    %c0_i32_0 = arith.constant 0 : i32
    %c0_i32_1 = arith.constant 0 : i32
    return %c0_i32, %c0_i32_0 : i32, i32
  }
  func.func @transform_8(%arg0: i32) -> (i32, i32) {
    %c0_i32 = arith.constant 0 : i32
    %c0_i32_0 = arith.constant 0 : i32
    %c0_i32_1 = arith.constant 0 : i32
    return %c0_i32, %c0_i32_0 : i32, i32
  }
  func.func @transform_9(%arg0: i32) -> i32 {
    %c0_i32 = arith.constant 0 : i32
    %c0_i32_0 = arith.constant 0 : i32
    return %c0_i32 : i32
  }
  func.func @transform_10(%arg0: i32) -> (i32, i32, i32) {
    %c0_i32 = arith.constant 0 : i32
    %c0_i32_0 = arith.constant 0 : i32
    %c0_i32_1 = arith.constant 0 : i32
    return %arg0, %c0_i32, %c0_i32_0 : i32, i32, i32
  }
}

</mosaic_0001>

<bundles_post_ra>
// kernel: sub.5
= control target key start
LH: loop header
LB: loop body
LE: loop exit
PB: predicated region body
PF: predicated region fallthrough
CT: control target
= control target key end

     0   :  { %s34_s0 = inlined_call_operand.vmem [shape: f32[8,1], index: 0, kind: input, shape index: {}]   ;;  %s35_s1 = inlined_call_operand.vmem [shape: f32[8,1], index: 1, kind: input, shape index: {}]   ;;  %s36_s2 = inlined_call_operand.vmem [shape: f32[8,1], index: 2, kind: output, shape index: {}]  }
   0x1   :  { %v3_v0 = vld [vmem:[%s34_s0] sm:$0xff] }
   0x2   :  { %v4_v1 = vld [vmem:[%s35_s1] sm:$0xff] }
   0x3   :  { %v7_v2 = vsub.f32 %v3_v0, %v4_v1 }
   0x5   :  { %9 = vst [vmem:[%s36_s2] sm:$0xff] %v7_v2 }

// kernel: sub.4
= control target key start
LH: loop header
LB: loop body
LE: loop exit
PB: predicated region body
PF: predicated region fallthrough
CT: control target
= control target key end

     0   :  { %s34_s0 = inlined_call_operand.vmem [shape: f32[8,4], index: 0, kind: input, shape index: {}]   ;;  %s35_s1 = inlined_call_operand.vmem [shape: f32[8,4], index: 1, kind: input, shape index: {}]   ;;  %s36_s2 = inlined_call_operand.vmem [shape: f32[8,4], index: 2, kind: output, shape index: {}]  }
   0x1   :  { %v3_v0 = vld [vmem:[%s34_s0] sm:$0xff] }
   0x2   :  { %v4_v1 = vld [vmem:[%s35_s1] sm:$0xff] }
   0x3   :  { %v7_v2 = vsub.f32 %v3_v0, %v4_v1 }
   0x5   :  { %9 = vst [vmem:[%s36_s2] sm:$0xff] %v7_v2 }

</bundles_post_ra>
